<compile_context>
chip_gen: v6e
topology: v6e:2x2x1
jax: 0.10.0
libtpu: 0.0.40
codegen_flags: <defaults>
</compile_context>

<pallas_src>
import jax
import jax.numpy as jnp
from jax.experimental import pallas as pl
from jax.experimental.pallas import tpu as pltpu


def _conv_relu_kernel(w_ref, x_ref, b_ref, o_ref):
    # w_ref: (Cout, K)  compute dtype   -- flattened conv weight (resident across grid)
    # x_ref: (K, tm)    compute dtype   -- transposed 2x2x2 patches tile (lane-dense)
    # b_ref: (Cout, 1)  f32             -- bias (resident)
    # o_ref: (Cout, tm) f32             -- lane-dense output tile
    acc = jnp.dot(w_ref[...], x_ref[...], preferred_element_type=jnp.float32)
    acc = acc + b_ref[...]
    o_ref[...] = jnp.maximum(acc, 0.0).astype(o_ref.dtype)


def _round_up(a, b):
    return ((a + b - 1) // b) * b


def _choose_tm(M, K, Cout, in_bytes, out_bytes, *, vmem_budget, tm_cap):
    """Pick the M-tile width: as large as the VMEM budget allows (double-buffered
    input + output tiles plus the resident weight), capped, and with >=2 grid
    steps when M allows so the grid axis shards across v7x's two TensorCores."""
    resident = K * Cout * in_bytes + Cout * 4          # weight + bias (single-buffered)
    per_col = 2 * (K * in_bytes + Cout * out_bytes)    # double-buffered in + out columns
    tm = (max(vmem_budget - resident, per_col * 128) // per_col) // 128 * 128
    tm = max(128, min(tm_cap, tm))
    if M > 128 and _round_up(M, tm) // tm < 2:
        tm = max(128, (_round_up(M, 128) // 2) // 128 * 128)
    return tm


def downsampling_conv_block(x, weight, bias, *, stride=2,
                            compute_dtype=jnp.bfloat16,
                            tm=None,
                            vmem_budget_bytes=24 * 1024 * 1024):
    """Conv3d(kernel=stride, stride=stride, padding=0) + ReLU.  NCDHW in / NCDHW out.

    x:      (N, Cin, D, H, W)
    weight: (Cout, Cin, s, s, s)   (PyTorch OIDHW layout)
    bias:   (Cout,)
    """
    N, Cin, D, H, W = x.shape
    Cout = weight.shape[0]
    s = stride
    Do, Ho, Wo = D // s, H // s, W // s
    K = Cin * s * s * s
    M = N * Do * Ho * Wo

    in_bytes = jnp.dtype(compute_dtype).itemsize
    out_bytes = 4  # f32 output
    if tm is None:
        tm = _choose_tm(M, K, Cout, in_bytes, out_bytes,
                        vmem_budget=vmem_budget_bytes, tm_cap=2048)
    M_pad = _round_up(M, tm)

    # --- glue: non-overlapping 2x2x2 patches, TRANSPOSED to (K, M) so the big M axis is
    # the minor (lane) dim both for this XLA relayout and for the kernel tiles.
    xp = x.reshape(N, Cin, Do, s, Ho, s, Wo, s)
    xp = xp.transpose(1, 3, 5, 7, 0, 2, 4, 6)            # (Cin, s, s, s, N, Do, Ho, Wo)
    patches_t = xp.reshape(K, M).astype(compute_dtype)
    # TODO(synk): fold this patch gather into the pipeline (BlockSpec over an (N, Do)
    # grid fetching (Cin, s, H, W) slabs, or keep the whole VNet channels-last) so the
    # relayout never round-trips HBM outside the kernel.
    if M_pad != M:
        patches_t = jnp.pad(patches_t, ((0, 0), (0, M_pad - M)))

    w_flat = weight.reshape(Cout, K).astype(compute_dtype)    # (Cout, K), resident in VMEM
    b_col = bias.reshape(Cout, 1).astype(jnp.float32)         # (Cout, 1)
    # NOTE: even at the deepest VNet stage (Cin=256 -> K=2048, Cout=512) the bf16 weight
    # is only 2 MiB, so keeping it fully resident (no K-grid axis) is fine.

    grid = (M_pad // tm,)
    cost = pl.CostEstimate(
        flops=2 * M_pad * K * Cout,
        transcendentals=0,
        bytes_accessed=(in_bytes * (M_pad * K + K * Cout)
                        + out_bytes * M_pad * Cout + 4 * Cout),
    )

    out_t = pl.pallas_call(
        _conv_relu_kernel,
        out_shape=jax.ShapeDtypeStruct((Cout, M_pad), jnp.float32),
        grid_spec=pltpu.PrefetchScalarGridSpec(
            num_scalar_prefetch=0,
            grid=grid,
            in_specs=[
                pl.BlockSpec((Cout, K), lambda i: (0, 0)),    # weight: no re-DMA per step
                pl.BlockSpec((K, tm), lambda i: (0, i)),      # patches^T tile (lane-dense)
                pl.BlockSpec((Cout, 1), lambda i: (0, 0)),    # bias
            ],
            out_specs=pl.BlockSpec((Cout, tm), lambda i: (0, i)),  # lane-dense output
        ),
        compiler_params=pltpu.CompilerParams(
            dimension_semantics=("parallel",),
            vmem_limit_bytes=32 * 1024 * 1024,
        ),
        cost_estimate=cost,
    )(w_flat, patches_t, b_col)

    out_t = out_t[:, :M]                                  # drop padded columns
    out = out_t.reshape(Cout, N, Do, Ho, Wo)
    return out.transpose(1, 0, 2, 3, 4)                   # leading-axis swap only -> NCDHW


def _reference(x, weight, bias, stride=2):
    # pure-JAX reference using lax conv (NCDHW / OIDHW)
    y = jax.lax.conv_general_dilated(
        x.astype(jnp.float32), weight.astype(jnp.float32),
        window_strides=(stride, stride, stride), padding="VALID",
        dimension_numbers=("NCDHW", "OIDHW", "NCDHW"))
    y = y + bias.reshape(1, -1, 1, 1, 1)
    return jnp.maximum(y, 0.0)


if __name__ == "__main__":
    key = jax.random.PRNGKey(0)
    k_x, k_w, k_b = jax.random.split(key, 3)

    # First VNet downsampling block (n_filters=16 -> 32), small spatial extent.
    N, Cin, Cout, S = 2, 16, 32, 16
    stride = 2

    x = jax.random.normal(k_x, (N, Cin, S, S, S), dtype=jnp.float32)
    weight = 0.1 * jax.random.normal(
        k_w, (Cout, Cin, stride, stride, stride), dtype=jnp.float32)
    bias = 0.05 * jax.random.normal(k_b, (Cout,), dtype=jnp.float32)

    ref = _reference(x, weight, bias, stride=stride)

    # Exact-semantics check: f32 operands, tight tolerance.
    out_f32 = jax.block_until_ready(
        downsampling_conv_block(x, weight, bias, stride=stride,
                                compute_dtype=jnp.float32))
    assert out_f32.shape == (N, Cout, S // stride, S // stride, S // stride)
    assert jnp.allclose(out_f32, ref, atol=1e-5, rtol=1e-5), "f32 mismatch vs reference"

    # Fast path: bf16 operands on the MXU, f32 accumulation/epilogue (looser tolerance).
    out_bf16 = jax.block_until_ready(
        downsampling_conv_block(x, weight, bias, stride=stride,
                                compute_dtype=jnp.bfloat16))
    assert out_bf16.shape == ref.shape
    assert jnp.allclose(out_bf16, ref, atol=5e-2, rtol=5e-2), "bf16 mismatch vs reference"

    print("KERNEL_OK")
</pallas_src>

<mosaic_0001>
module attributes {stable_mosaic.version = 11 : i64} {
  func.func @_conv_relu_kernel(%arg0: i32, %arg1: memref<32x128xf32, #tpu.memory_space<vmem>>, %arg2: memref<128x512xf32, #tpu.memory_space<vmem>>, %arg3: memref<32x1xf32, #tpu.memory_space<vmem>>, %arg4: memref<32x512xf32, #tpu.memory_space<vmem>>) attributes {dimension_semantics = [#tpu.dimension_semantics<parallel>], iteration_bounds = array<i64: 2>, scalar_prefetch = 0 : i64, scratch_operands = 0 : i64, tpu.core_type = #tpu.core_type<tc>, window_params = [{pipeline_mode = #tpu.pipeline_mode<synchronous>, transform_indices = @transform_0, window_bounds = array<i64: 32, 128>}, {transform_indices = @transform_1, window_bounds = array<i64: 128, 512>}, {pipeline_mode = #tpu.pipeline_mode<synchronous>, transform_indices = @transform_2, window_bounds = array<i64: 32, 1>}, {transform_indices = @transform_3, window_bounds = array<i64: 32, 512>}]} {
    %c0 = arith.constant 0 : index
    %c0_0 = arith.constant 0 : index
    %0 = vector.load %arg1[%c0, %c0_0] : memref<32x128xf32, #tpu.memory_space<vmem>>, vector<32x128xf32>
    %c0_1 = arith.constant 0 : index
    %c0_2 = arith.constant 0 : index
    %1 = vector.load %arg2[%c0_1, %c0_2] : memref<128x512xf32, #tpu.memory_space<vmem>>, vector<128x512xf32>
    %cst = arith.constant dense<0.000000e+00> : vector<32x512xf32>
    %2 = tpu.matmul %0, %1, %cst {dimension_numbers = #tpu.dot_dimension_numbers<[1], [0], [0], [1], [0, 0, 1, 1], [], []>} : vector<32x128xf32>, vector<128x512xf32>, vector<32x512xf32> -> vector<32x512xf32>
    %c0_3 = arith.constant 0 : index
    %c0_4 = arith.constant 0 : index
    %3 = vector.load %arg3[%c0_3, %c0_4] : memref<32x1xf32, #tpu.memory_space<vmem>>, vector<32x1xf32>
    %4 = vector.broadcast %3 : vector<32x1xf32> to vector<32x512xf32>
    %5 = arith.addf %2, %4 : vector<32x512xf32>
    %cst_5 = arith.constant 0.000000e+00 : f32
    %6 = vector.broadcast %cst_5 : f32 to vector<32x512xf32>
    %7 = arith.maximumf %5, %6 : vector<32x512xf32>
    %c0_6 = arith.constant 0 : index
    %c0_7 = arith.constant 0 : index
    %8 = vector.load %arg4[%c0_6, %c0_7] : memref<32x512xf32, #tpu.memory_space<vmem>>, vector<32x512xf32>
    tpu.vector_store %arg4[%c0_6, %c0_7], %7 {strides = array<i32>} : memref<32x512xf32, #tpu.memory_space<vmem>>, vector<32x512xf32>,
    return
  }
  func.func @transform_0(%arg0: i32) -> (i32, i32) {
    %c0_i32 = arith.constant 0 : i32
    %c0_i32_0 = arith.constant 0 : i32
    %c0_i32_1 = arith.constant 0 : i32
    return %c0_i32, %c0_i32_0 : i32, i32
  }
  func.func @transform_1(%arg0: i32) -> (i32, i32) {
    %c0_i32 = arith.constant 0 : i32
    %c0_i32_0 = arith.constant 0 : i32
    return %c0_i32, %arg0 : i32, i32
  }
  func.func @transform_2(%arg0: i32) -> (i32, i32) {
    %c0_i32 = arith.constant 0 : i32
    %c0_i32_0 = arith.constant 0 : i32
    %c0_i32_1 = arith.constant 0 : i32
    return %c0_i32, %c0_i32_0 : i32, i32
  }
  func.func @transform_3(%arg0: i32) -> (i32, i32) {
    %c0_i32 = arith.constant 0 : i32
    %c0_i32_0 = arith.constant 0 : i32
    return %c0_i32, %arg0 : i32, i32
  }
}

</mosaic_0001>

<bundles_post_ra>
// kernel: tpu_custom_call.1
= control target key start
LH: loop header
LB: loop body
LE: loop exit
PB: predicated region body
PF: predicated region fallthrough
CT: control target
= control target key end

     0   :  { %8 = vsyncpa [#allocation3], 0  ;;  %s1050_s0 = inlined_call_operand.vmem [shape: f32[32,128], index: 0, kind: input, shape index: {}]   ;;  %s1051_s1 = inlined_call_operand.hbm [shape: f32[128,1024], index: 1, kind: input, shape index: {}]   ;;  %s1052_s2 = inlined_call_operand.vmem [shape: f32[32,1], index: 2, kind: input, shape index: {}]   ;;  %s1053_s3 = inlined_call_operand.hbm [shape: f32[32,1024], index: 3, kind: output, shape index: {}]  }
   0x1   :  { %10 = vsyncpa [#allocation3 + $0x1], 0 }
   0x2   :  { %11 = vsyncpa [#allocation4], 0 }
   0x3   :  { %13 = vsyncpa [#allocation4 + $0x1], 0  ;;  %s776_s12 = smov 0   ;;  %s778_s13 = smov 0  }
   0x4   :  { %s780_s14 = smov 0   ;;  %s782_s15 = smov 0  }
   0x5 LB: > { %s797_s16 = sadd.s32 4294967295, %s744_s15   ;;  %s580_s17 = sadd.s32 4294967294, %s744_s15   ;;  %s744_s15 = sphi %s782_s15, %s1069_s15   ;;  %s740_s14 = sphi %s780_s14, %s1068_s14   ;;  %s736_s13 = sphi %s778_s13, %s1067_s13   ;;  %s732_s12 = sphi %s776_s12, %s1066_s12  }
   0x6   : > { %s801_s18 = sadd.s32 1, %s744_s15   ;;  %s47_s19 = sadd.s32 1, %s740_s14 }
   0x7   : > { %s44_s20 = ssub.s32 %s744_s15, %s801_s18  ;;  %p54_p0 = scmp.ne.s32.totalorder %s740_s14, %s736_s13 }
   0x8   : > { %p45_p1 = scmp.eq.s32.totalorder %s44_s20, 0  ;;  %p55_p2 = scmp.eq.s32.totalorder %s744_s15, 0 }
   0x9   : > { %p60_p3 = scmp.ne.s32.totalorder %s736_s13, %s732_s12  ;;  %p61_p4 = scmp.eq.s32.totalorder %s797_s16, 0 }
   0xa   : > { %s813_s21 = scalar_select %p45_p1, %s740_s14, %s47_s19  }
   0xb   : > { %p815_p5 = por %p55_p2, %p54_p0  ;;  %p819_p6 = por %p61_p4, %p60_p3 }
   0xc   : > { %p105_p7 = scmp.eq.s32.totalorder %s797_s16, 1  ;;  %p111_p8 = scmp.eq.s32.totalorder %s580_s17, 1 }
   0xd   : > { %s1057_s23 = scalar_select %p819_p6, 1, 0 }
   0xe   : > { %p608_p10 = scmp.lt.s32.totalorder %s744_s15, 2  ;;  %p826_p11 = por %p105_p7, %p54_p0 }
   0xf   : > { %p830_p12 = por %p111_p8, %p60_p3  ;;  %s137_s26 = sand.u32 1, %s740_s14  }
  0x10   : > { %s1058_s24 = scalar_select %p826_p11, 1, 0 }
  0x11   : > { %s1059_s25 = scalar_select %p830_p12, 1, 0 }
  0x12   : > { %s594_s27 = sshll.u32 %s744_s15, 9  ;;  %s583_s28 = sshll.u32 %s137_s26, 9 }
  0x13   : > { %s839_s4 = scalar_lea.hbm %s1051_s1, %s594_s27  ;;  %s141_s5 = scalar_lea.vmem [#allocation2], %s583_s28 }
  0x14   : > { %s148_s6 = sshll.u32 %s141_s5, 4  ;;  %p843_p13 = pnand %p608_p10, %p815_p5  ;;  %s847_s6 = int_to_ptr.vmem [resolvable:$true] %s148_s6 }
  0x15   : > { %s850_s8 = scalar_lea.sflag [#allocation3], %s137_s26  ;;  %s652_s9 = scalar_lea.hbm %s839_s4, 8192 }
  0x16   : > { %p653_p1 = scmp.ne.s32.totalorder %s839_s4, %s652_s9  ;;  %p654_p2 = pneg %p843_p13 }
  0x17   : > { %s657_s17 = scalar_lea.hbm %s1051_s1, 16384  ;;  %p658_p5 = scmp.lt.s32.totalorder %s839_s4, %s1051_s1 }
  0x18   : > { %p655_p3 = pnand %p654_p2, %p653_p1  ;;  %p659_p7 = scmp.lt.s32.totalorder %s657_s17, %s652_s9 }
  0x1a   : > { %p656_p4 = pneg %p655_p3  ;;  %p660_p8 = por %p659_p7, %p658_p5 }
  0x1c   : > { %p661_p10 = pnand %p660_p8, %p656_p4 }
  0x1e   : > { %664 = shalt.err (!%p661_p10)
}
  0x1f   : > { %s665_s22 = scalar_lea.vmem %s847_s6, 8192  ;;  %s746_s26 = smov [#allocation2]  }
  0x20   : > { %p666_p9 = scmp.ne.s32.totalorder %s847_s6, %s665_s22  ;;  %s670_s27 = sshll.u32 %s746_s26, 4  ;;  %s671_s27 = int_to_ptr.vmem [resolvable:$false] %s670_s27 }
  0x21   : > { %s672_s28 = scalar_lea.vmem %s671_s27, 16384  ;;  %p673_p3 = scmp.lt.s32.totalorder %s847_s6, %s671_s27 }
  0x22   : > { %p668_p0 = pnand %p666_p9, %p654_p2  ;;  %p674_p12 = scmp.lt.s32.totalorder %s672_s28, %s665_s22 }
  0x24   : > { %p669_p1 = pneg %p668_p0  ;;  %p675_p11 = por %p674_p12, %p673_p3 }
  0x26   : > { %p676_p6 = pnand %p675_p11, %p669_p1 }
  0x28   : > { %679 = shalt.err (!%p676_p6)
}
  0x29   : > { %s747_s29 = smov 1024   ;;  %s748_s30 = smov 512  }
  0x2a   : > { %s749_s5 = smov 32   ;;  %p156_p9 = scmp.lt.s32.totalorder %s744_s15, 3 }
  0x2b   : > { %603 = dma.hbm_to_vmem [thread:$0]  (!%p843_p13), %s839_s4, 8192, %s847_s6, %s850_s8, %s747_s29, %s748_s30, %s749_s5  }
  0x2c   : > { %p1061_p0 = scmp.ge.s32.totalorder %s744_s15, 1 }
  0x2e   : > { %p157_p2 = pnand %p1061_p0, %p156_p9 }
  0x2f   : > { %s875_s9 = sand.u32 (!%p157_p2), 1, %s736_s13   ;;  %p1062_p6 = scmp.ne.s32.totalorder (!%p157_p2), %s1057_s23, 0 }
  0x30   : > { %160 = sbr.rel (%p157_p2) target bundleno = 315 (0x13b), region = 32  ;;  %s587_s10 = sshll.u32 (!%p157_p2), %s875_s9, 9 }
  0x31   : > { %s163_s11 = scalar_lea.sflag (!%p157_p2), [#allocation3], %s875_s9  ;;  %s879_s17 = scalar_lea.vmem (!%p157_p2), [#allocation2], %s587_s10 }
  0x35   : > { %723 = dma.done.wait (%p1062_p6), %s163_s11, 8192  }
  0x36   : > { %725 = vsyncadd (%p1062_p6), %s163_s11, 4294959104  ;;  %v750_v0 = vmov 0.0   ;;  %v751_v1 = vmov 0   ;;  %v256_v2 = vld [vmem:[%s879_s17 + $0x1e8] sm:$0xff]  ;;  %v258_v3 = vld [vmem:[%s879_s17 + $0x1f8] sm:$0xff]  ;;  %s595_s4 = sshll.u32 %s797_s16, 9 }
  0x37   : > { %347 = vmatprep.mubr.f32.mxu0 %v750_v0  ;;  %436 = vmatprep.mubr.f32.mxu1 %v750_v0  ;;  %v255_v4 = vld [vmem:[%s879_s17 + $0x1e0] sm:$0xff]  ;;  %v257_v5 = vld [vmem:[%s879_s17 + $0x1f0] sm:$0xff]  ;;  %v252_v6 = vld [vmem:[%s879_s17 + $0x1c8] sm:$0xff]  ;;  %s1001_s8 = scalar_lea.hbm %s1053_s3, %s595_s4  ;;  %s494_s19 = scalar_lea.sflag [#allocation4], %s875_s9 }
  0x38   : > { %650 = vset.pattern.permute.xlu0 %v751_v1  ;;  %651 = vset.pattern.permute.xlu1 %v751_v1  ;;  %v254_v7 = vld [vmem:[%s879_s17 + $0x1d8] sm:$0xff]  ;;  %v251_v8 = vld [vmem:[%s879_s17 + $0x1c0] sm:$0xff]  ;;  %v253_v9 = vld [vmem:[%s879_s17 + $0x1d0] sm:$0xff]  ;;  %p1063_p12 = scmp.ne.s32.totalorder %s1058_s24, 0  ;;  %s752_s22 = smov [#allocation5]  }
  0x39   : > { %283 = vmatprep.subr.mxu0 %v256_v2  ;;  %372 = vmatprep.subr.mxu1 %v258_v3  ;;  %v248_v10 = vld [vmem:[%s879_s17 + $0x1a8] sm:$0xff]  ;;  %v250_v11 = vld [vmem:[%s879_s17 + $0x1b8] sm:$0xff]  ;;  %v247_v12 = vld [vmem:[%s879_s17 + $0x1a0] sm:$0xff]  ;;  %s684_s26 = sshll.u32 %s752_s22, 4  ;;  %s685_s26 = int_to_ptr.vmem [resolvable:$false] %s684_s26 }
  0x3a   : > { %284 = vmatpush1.msra.mxu0 %v255_v4  ;;  %373 = vmatpush1.msra.mxu1 %v257_v5  ;;  %v249_v13 = vld [vmem:[%s879_s17 + $0x1b0] sm:$0xff]  ;;  %v244_v14 = vld [vmem:[%s879_s17 + $0x188] sm:$0xff]  ;;  %v246_v15 = vld [vmem:[%s879_s17 + $0x198] sm:$0xff]  ;;  %s686_s27 = scalar_lea.vmem %s685_s26, 4096 }
  0x3b   : > { %285 = vmatprep.subr.mxu0 %v252_v6  ;;  %374 = vmatprep.subr.mxu1 %v254_v7  ;;  %v243_v16 = vld [vmem:[%s879_s17 + $0x180] sm:$0xff]  ;;  %v245_v17 = vld [vmem:[%s879_s17 + $0x190] sm:$0xff]  ;;  %v240_v18 = vld [vmem:[%s879_s17 + $0x168] sm:$0xff] }
  0x3c   : > { %286 = vmatpush1.msra.mxu0 %v251_v8  ;;  %375 = vmatpush1.msra.mxu1 %v253_v9  ;;  %v242_v19 = vld [vmem:[%s879_s17 + $0x178] sm:$0xff]  ;;  %v239_v20 = vld [vmem:[%s879_s17 + $0x160] sm:$0xff]  ;;  %v241_v21 = vld [vmem:[%s879_s17 + $0x170] sm:$0xff] }
  0x3d   : > { %287 = vmatprep.subr.mxu0 %v248_v10  ;;  %376 = vmatprep.subr.mxu1 %v250_v11  ;;  %v236_v22 = vld [vmem:[%s879_s17 + $0x148] sm:$0xff]  ;;  %v238_v23 = vld [vmem:[%s879_s17 + $0x158] sm:$0xff]  ;;  %v235_v24 = vld [vmem:[%s879_s17 + $0x140] sm:$0xff] }
  0x3e   : > { %288 = vmatpush1.msra.mxu0 %v247_v12  ;;  %377 = vmatpush1.msra.mxu1 %v249_v13  ;;  %v237_v25 = vld [vmem:[%s879_s17 + $0x150] sm:$0xff]  ;;  %v232_v26 = vld [vmem:[%s879_s17 + $0x128] sm:$0xff]  ;;  %v234_v27 = vld [vmem:[%s879_s17 + $0x138] sm:$0xff] }
  0x3f   : > { %289 = vmatprep.subr.mxu0 %v244_v14  ;;  %378 = vmatprep.subr.mxu1 %v246_v15  ;;  %v231_v28 = vld [vmem:[%s879_s17 + $0x120] sm:$0xff]  ;;  %v233_v29 = vld [vmem:[%s879_s17 + $0x130] sm:$0xff]  ;;  %v228_v30 = vld [vmem:[%s879_s17 + $0x108] sm:$0xff] }
  0x40   : > { %290 = vmatpush1.msra.mxu0 %v243_v16  ;;  %379 = vmatpush1.msra.mxu1 %v245_v17  ;;  %v230_v31 = vld [vmem:[%s879_s17 + $0x118] sm:$0xff]  ;;  %v227_v32 = vld [vmem:[%s879_s17 + $0x100] sm:$0xff]  ;;  %v229_v33 = vld [vmem:[%s879_s17 + $0x110] sm:$0xff] }
  0x41   : > { %291 = vmatprep.subr.mxu0 %v240_v18  ;;  %380 = vmatprep.subr.mxu1 %v242_v19  ;;  %v224_v34 = vld [vmem:[%s879_s17 + $0xe8] sm:$0xff]  ;;  %v226_v35 = vld [vmem:[%s879_s17 + $0xf8] sm:$0xff]  ;;  %v223_v36 = vld [vmem:[%s879_s17 + $0xe0] sm:$0xff] }
  0x42   : > { %292 = vmatpush1.msra.mxu0 %v239_v20  ;;  %381 = vmatpush1.msra.mxu1 %v241_v21  ;;  %v225_v37 = vld [vmem:[%s879_s17 + $0xf0] sm:$0xff]  ;;  %v220_v38 = vld [vmem:[%s879_s17 + $0xc8] sm:$0xff]  ;;  %v222_v39 = vld [vmem:[%s879_s17 + $0xd8] sm:$0xff] }
  0x43   : > { %293 = vmatprep.subr.mxu0 %v236_v22  ;;  %382 = vmatprep.subr.mxu1 %v238_v23  ;;  %v219_v40 = vld [vmem:[%s879_s17 + $0xc0] sm:$0xff]  ;;  %v221_v41 = vld [vmem:[%s879_s17 + $0xd0] sm:$0xff]  ;;  %v216_v42 = vld [vmem:[%s879_s17 + $0xa8] sm:$0xff] }
  0x44   : > { %294 = vmatpush1.msra.mxu0 %v235_v24  ;;  %383 = vmatpush1.msra.mxu1 %v237_v25  ;;  %v218_v43 = vld [vmem:[%s879_s17 + $0xb8] sm:$0xff]  ;;  %v215_v44 = vld [vmem:[%s879_s17 + $0xa0] sm:$0xff]  ;;  %v217_v45 = vld [vmem:[%s879_s17 + $0xb0] sm:$0xff] }
  0x45   : > { %295 = vmatprep.subr.mxu0 %v232_v26  ;;  %384 = vmatprep.subr.mxu1 %v234_v27  ;;  %v212_v46 = vld [vmem:[%s879_s17 + $0x88] sm:$0xff]  ;;  %v214_v47 = vld [vmem:[%s879_s17 + $0x98] sm:$0xff]  ;;  %v211_v48 = vld [vmem:[%s879_s17 + $0x80] sm:$0xff] }
  0x46   : > { %296 = vmatpush1.msra.mxu0 %v231_v28  ;;  %385 = vmatpush1.msra.mxu1 %v233_v29  ;;  %v213_v49 = vld [vmem:[%s879_s17 + $0x90] sm:$0xff]  ;;  %v208_v50 = vld [vmem:[%s879_s17 + $0x68] sm:$0xff]  ;;  %v210_v51 = vld [vmem:[%s879_s17 + $0x78] sm:$0xff] }
  0x47   : > { %297 = vmatprep.subr.mxu0 %v228_v30  ;;  %386 = vmatprep.subr.mxu1 %v230_v31  ;;  %v207_v52 = vld [vmem:[%s879_s17 + $0x60] sm:$0xff]  ;;  %v209_v53 = vld [vmem:[%s879_s17 + $0x70] sm:$0xff]  ;;  %v204_v54 = vld [vmem:[%s879_s17 + $0x48] sm:$0xff] }
  0x48   : > { %298 = vmatpush1.msra.mxu0 %v227_v32  ;;  %387 = vmatpush1.msra.mxu1 %v229_v33  ;;  %v206_v55 = vld [vmem:[%s879_s17 + $0x58] sm:$0xff]  ;;  %v203_v56 = vld [vmem:[%s879_s17 + $0x40] sm:$0xff]  ;;  %v205_v57 = vld [vmem:[%s879_s17 + $0x50] sm:$0xff] }
  0x49   : > { %299 = vmatprep.subr.mxu0 %v224_v34  ;;  %388 = vmatprep.subr.mxu1 %v226_v35  ;;  %v200_v58 = vld [vmem:[%s879_s17 + $0x28] sm:$0xff]  ;;  %v202_v59 = vld [vmem:[%s879_s17 + $0x38] sm:$0xff]  ;;  %v199_v60 = vld [vmem:[%s879_s17 + $0x20] sm:$0xff] }
  0x4a   : > { %300 = vmatpush1.msra.mxu0 %v223_v36  ;;  %389 = vmatpush1.msra.mxu1 %v225_v37  ;;  %v201_v61 = vld [vmem:[%s879_s17 + $0x30] sm:$0xff]  ;;  %v196_v62 = vld [vmem:[%s879_s17 + $0x8] sm:$0xff]  ;;  %v198_v63 = vld [vmem:[%s879_s17 + $0x18] sm:$0xff] }
  0x4b   : > { %301 = vmatprep.subr.mxu0 %v220_v38  ;;  %390 = vmatprep.subr.mxu1 %v222_v39  ;;  %v195_v1 = vld [vmem:[%s879_s17] sm:$0xff]  ;;  %v197_v2 = vld [vmem:[%s879_s17 + $0x10] sm:$0xff]  ;;  %v192_v6 = vld [vmem:[%s1050_s0 + $0x8] sm:$0xff]  ;;  %s588_s17 = sshll.u32 %s875_s9, 7 }
  0x4c   : > { %302 = vmatpush1.msra.mxu0 %v219_v40  ;;  %391 = vmatpush1.msra.mxu1 %v221_v41  ;;  %v191_v3 = vld [vmem:[%s1050_s0] sm:$0xff]  ;;  %v261_v5 = vld [vmem:[%s1052_s2 + $0x10] sm:$0xff]  ;;  %v260_v7 = vld [vmem:[%s1052_s2 + $0x8] sm:$0xff]  ;;  %s982_s23 = scalar_lea.vmem [#allocation5], %s588_s17 }
  0x4d   : > { %303 = vmatprep.subr.mxu0 %v216_v42  ;;  %392 = vmatprep.subr.mxu1 %v218_v43  ;;  %v259_v4 = vld [vmem:[%s1052_s2] sm:$0xff]  ;;  %v262_v8 = vld [vmem:[%s1052_s2 + $0x18] sm:$0xff]  ;;  %v193_v9 = vld [vmem:[%s1050_s0 + $0x10] sm:$0xff]  ;;  %s507_s6 = sshll.u32 %s982_s23, 4  ;;  %s1003_s6 = int_to_ptr.vmem [resolvable:$true] %s507_s6 }
  0x4e   : > { %304 = vmatpush1.msra.mxu0 %v215_v44  ;;  %393 = vmatpush1.msra.mxu1 %v217_v45  ;;  %v194_v10 = vld [vmem:[%s1050_s0 + $0x18] sm:$0xff]  ;;  %s680_s20 = scalar_lea.vmem %s1003_s6, 2048  ;;  %p687_p5 = scmp.lt.s32.totalorder %s1003_s6, %s685_s26 }
  0x4f   : > { %305 = vmatprep.subr.mxu0 %v212_v46  ;;  %394 = vmatprep.subr.mxu1 %v214_v47  ;;  %p681_p11 = scmp.ne.s32.totalorder %s1003_s6, %s680_s20  ;;  %p688_p7 = scmp.lt.s32.totalorder %s686_s27, %s680_s20 }
  0x50   : > { %306 = vmatpush1.msra.mxu0 %v211_v48  ;;  %395 = vmatpush1.msra.mxu1 %v213_v49 }
  0x51   : > { %307 = vmatprep.subr.mxu0 %v208_v50  ;;  %396 = vmatprep.subr.mxu1 %v210_v51  ;;  %p682_p13 = pnand %p681_p11, %p1063_p12  ;;  %p689_p8 = por %p688_p7, %p687_p5 }
  0x52   : > { %308 = vmatpush1.msra.mxu0 %v207_v52  ;;  %397 = vmatpush1.msra.mxu1 %v209_v53 }
  0x53   : > { %309 = vmatprep.subr.mxu0 %v204_v54  ;;  %398 = vmatprep.subr.mxu1 %v206_v55  ;;  %p683_p4 = pneg %p682_p13 }
  0x54   : > { %310 = vmatpush1.msra.mxu0 %v203_v56  ;;  %399 = vmatpush1.msra.mxu1 %v205_v57 }
  0x55   : > { %311 = vmatprep.subr.mxu0 %v200_v58  ;;  %400 = vmatprep.subr.mxu1 %v202_v59  ;;  %p690_p10 = pnand %p689_p8, %p683_p4 }
  0x56   : > { %312 = vmatpush1.msra.mxu0 %v199_v60  ;;  %401 = vmatpush1.msra.mxu1 %v201_v61 }
  0x57   : > { %313 = vmatprep.subr.mxu0 %v196_v62  ;;  %402 = vmatprep.subr.mxu1 %v198_v63 }
  0x58   : > { %314 = vmatpush1.msra.mxu0 %v195_v1  ;;  %403 = vmatpush1.msra.mxu1 %v197_v2 }
  0x59   : > { %348 = vmatmul.mubr.f32.vlgmr.msra.gmra.mxu0 %v191_v3  ;;  %437 = vmatmul.mubr.f32.vlgmr.msra.gmra.mxu1 %v191_v3 }
  0x5a   : > { %353 = vmatprep.mubr.f32.mxu0 %v750_v0  ;;  %442 = vmatprep.mubr.f32.mxu1 %v750_v0 }
  0x5b   : > { %265 = vperm.xlu0 %650, %v259_v4   ;;  %275 = vperm.xlu1 %651, %v261_v5  }
  0x5d   : > { %354 = vmatmul.mubr.f32.gmra.mxu0 %v192_v6  ;;  %443 = vmatmul.mubr.f32.gmra.mxu1 %v192_v6 }
  0x5e   : > { %359 = vmatprep.mubr.f32.mxu0 %v750_v0  ;;  %448 = vmatprep.mubr.f32.mxu1 %v750_v0 }
  0x5f   : > { %270 = vperm.xlu0 %650, %v260_v7   ;;  %280 = vperm.xlu1 %651, %v262_v8  }
  0x61   : > { %360 = vmatmul.mubr.f32.gmra.mxu0 %v193_v9  ;;  %449 = vmatmul.mubr.f32.gmra.mxu1 %v193_v9 }
  0x62   : > { %365 = vmatprep.mubr.f32.mxu0 %v750_v0  ;;  %454 = vmatprep.mubr.f32.mxu1 %v750_v0 }
  0x65   : > { %366 = vmatmul.mubr.f32.gmra.mxu0 %v194_v10  ;;  %455 = vmatmul.mubr.f32.gmra.mxu1 %v194_v10 }
  0xd6   : > { %v266_v11 = vpop.permute.xlu0 %265  ;;  %v276_v28 = vpop.permute.xlu1 %275 }
  0xda   : > { %v271_v16 = vpop.permute.xlu0 %270  ;;  %v281_v45 = vpop.permute.xlu1 %280 }
 0x119   : > { %v349_v12 = vpop.f32.mrf.mxu0  ;;  %v438_v13 = vpop.f32.mrf.mxu1 }
 0x11a   : > { %v350_v14 = vadd.f32 %v349_v12, %v266_v11  ;;  %v439_v15 = vadd.f32 %v438_v13, %v266_v11 }
 0x11b   : > { %v351_v17 = vpop.f32.mrf.mxu0  ;;  %v440_v18 = vpop.f32.mrf.mxu1 }
 0x11c   : > { %v461_v19 = vmax.f32 %v350_v14, 0.0  ;;  %v463_v20 = vmax.f32 %v439_v15, 0.0  ;;  %v352_v21 = vadd.f32 %v351_v17, %v266_v11  ;;  %v441_v22 = vadd.f32 %v440_v18, %v266_v11 }
 0x11d   : > { %v355_v0 = vpop.f32.mrf.mxu0  ;;  %v444_v23 = vpop.f32.mrf.mxu1 }
 0x11e   : > { %477 = vst [vmem:[%s982_s23] sm:$0xff] %v461_v19  ;;  %479 = vst [vmem:[%s982_s23 + $0x10] sm:$0xff] %v463_v20  ;;  %v462_v24 = vmax.f32 %v352_v21, 0.0  ;;  %v464_v25 = vmax.f32 %v441_v22, 0.0  ;;  %v356_v26 = vadd.f32 %v355_v0, %v271_v16  ;;  %v445_v27 = vadd.f32 %v444_v23, %v271_v16 }
 0x11f   : > { %v357_v29 = vpop.f32.mrf.mxu0  ;;  %v446_v30 = vpop.f32.mrf.mxu1 }
 0x120   : > { %478 = vst [vmem:[%s982_s23 + $0x8] sm:$0xff] %v462_v24  ;;  %480 = vst [vmem:[%s982_s23 + $0x18] sm:$0xff] %v464_v25  ;;  %v465_v31 = vmax.f32 %v356_v26, 0.0  ;;  %v467_v32 = vmax.f32 %v445_v27, 0.0  ;;  %v358_v33 = vadd.f32 %v357_v29, %v271_v16  ;;  %v447_v34 = vadd.f32 %v446_v30, %v271_v16 }
 0x121   : > { %v361_v35 = vpop.f32.mrf.mxu0  ;;  %v450_v36 = vpop.f32.mrf.mxu1 }
 0x122   : > { %481 = vst [vmem:[%s982_s23 + $0x20] sm:$0xff] %v465_v31  ;;  %483 = vst [vmem:[%s982_s23 + $0x30] sm:$0xff] %v467_v32  ;;  %v466_v37 = vmax.f32 %v358_v33, 0.0  ;;  %v468_v38 = vmax.f32 %v447_v34, 0.0  ;;  %v362_v39 = vadd.f32 %v361_v35, %v276_v28  ;;  %v451_v40 = vadd.f32 %v450_v36, %v276_v28 }
 0x123   : > { %v363_v41 = vpop.f32.mrf.mxu0  ;;  %v452_v42 = vpop.f32.mrf.mxu1 }
 0x124   : > { %482 = vst [vmem:[%s982_s23 + $0x28] sm:$0xff] %v466_v37  ;;  %484 = vst [vmem:[%s982_s23 + $0x38] sm:$0xff] %v468_v38  ;;  %v469_v43 = vmax.f32 %v362_v39, 0.0  ;;  %v471_v44 = vmax.f32 %v451_v40, 0.0  ;;  %v364_v46 = vadd.f32 %v363_v41, %v276_v28  ;;  %v453_v47 = vadd.f32 %v452_v42, %v276_v28 }
 0x125   : > { %v367_v48 = vpop.f32.mrf.mxu0  ;;  %v456_v49 = vpop.f32.mrf.mxu1 }
 0x126   : > { %485 = vst [vmem:[%s982_s23 + $0x40] sm:$0xff] %v469_v43  ;;  %487 = vst [vmem:[%s982_s23 + $0x50] sm:$0xff] %v471_v44  ;;  %v470_v50 = vmax.f32 %v364_v46, 0.0  ;;  %v472_v51 = vmax.f32 %v453_v47, 0.0  ;;  %v368_v52 = vadd.f32 %v367_v48, %v281_v45  ;;  %v457_v53 = vadd.f32 %v456_v49, %v281_v45 }
 0x127   : > { %v369_v54 = vpop.f32.mrf.mxu0  ;;  %v458_v55 = vpop.f32.mrf.mxu1 }
 0x128   : > { %486 = vst [vmem:[%s982_s23 + $0x48] sm:$0xff] %v470_v50  ;;  %488 = vst [vmem:[%s982_s23 + $0x58] sm:$0xff] %v472_v51  ;;  %v473_v56 = vmax.f32 %v368_v52, 0.0  ;;  %v475_v57 = vmax.f32 %v457_v53, 0.0  ;;  %v370_v58 = vadd.f32 %v369_v54, %v281_v45  ;;  %v459_v59 = vadd.f32 %v458_v55, %v281_v45 }
 0x12a   : > { %489 = vst [vmem:[%s982_s23 + $0x60] sm:$0xff] %v473_v56  ;;  %491 = vst [vmem:[%s982_s23 + $0x70] sm:$0xff] %v475_v57  ;;  %v474_v60 = vmax.f32 %v370_v58, 0.0  ;;  %v476_v61 = vmax.f32 %v459_v59, 0.0 }
 0x12c   : > { %490 = vst [vmem:[%s982_s23 + $0x68] sm:$0xff] %v474_v60  ;;  %492 = vst [vmem:[%s982_s23 + $0x78] sm:$0xff] %v476_v61 }
 0x12d   : > { %693 = shalt.err (!%p690_p10)
}
 0x12e   : > { %s694_s28 = scalar_lea.hbm %s1001_s8, 2048  ;;  %s698_s5 = scalar_lea.hbm %s1053_s3, 4096 }
 0x12f   : > { %p695_p1 = scmp.ne.s32.totalorder %s1001_s8, %s694_s28  ;;  %p699_p0 = scmp.lt.s32.totalorder %s1001_s8, %s1053_s3 }
 0x130   : > { %p700_p2 = scmp.lt.s32.totalorder %s698_s5, %s694_s28 }
 0x131   : > { %p696_p3 = pnand %p695_p1, %p1063_p12 }
 0x132   : > { %p701_p6 = por %p700_p2, %p699_p0 }
 0x133   : > { %p697_p9 = pneg %p696_p3 }
 0x135   : > { %p702_p11 = pnand %p701_p6, %p697_p9 }
 0x137   : > { %705 = shalt.err (!%p702_p11)
}
 0x138   : > { %s753_s17 = smov 512   ;;  %s754_s23 = smov 1024  }
 0x139   : > { %s755_s4 = smov 32  }
 0x13a   : > { %598 = dma.vmem_to_hbm [thread:$0]  (%p1063_p12), %s1003_s6, 2048, %s1001_s8, %s494_s19, %s753_s17, %s754_s23, %s755_s4  }
 0x13b PF: > { %s522_s16 = sand.u32 1, %s732_s12   ;;  %p1064_p13 = scmp.ne.s32.totalorder %s1059_s25, 0 }
 0x13c   : > { %p1065_p4 = scmp.ge.s32.totalorder %s744_s15, 2  ;;  %s523_s7 = scalar_lea.sflag [#allocation4], %s522_s16 }
 0x13e   : > { %p605_p5 = pnand %p1065_p4, %p1064_p13 }
 0x140   : > { %p606_p7 = pneg %p605_p5 }
 0x142   : > { %727 = dma.done.wait (%p606_p7), %s523_s7, 2048  }
 0x143   : > { %729 = vsyncadd (%p606_p7), %s523_s7, 4294965248  ;;  %p16_p8 = scmp.ge.s32.totalorder %s801_s18, 4   ;;  %s1066_s12 = smov %s736_s13 }
 0x144   : > { %s1067_s13 = smov %s740_s14  ;;  %s1068_s14 = smov %s813_s21 }
 0x145   : > { %s1069_s15 = smov %s801_s18  ;;  %18 = sbr.rel (!%p16_p8) target bundleno = 5 (0x5), region = 77 }
 0x14a   :  { %528 = vsyncpa [#allocation3], 1 }
 0x14b   :  { %530 = vsyncpa [#allocation3 + $0x1], 1 }
 0x14c   :  { %531 = vsyncpa [#allocation4], 1 }
 0x14d   :  { %533 = vsyncpa [#allocation4 + $0x1], 1 }

</bundles_post_ra>
